<compile_context>
chip_gen: v5e
topology: v5e:2x2
jax: 0.10.0
libtpu: 0.0.40
codegen_flags: <defaults>
</compile_context>

<pallas_src>
import functools

import jax
import jax.numpy as jnp
from jax.experimental import pallas as pl
from jax.experimental.pallas import tpu as pltpu


def _round_up(x, m):
    return (x + m - 1) // m * m


def _vmem_capacity_bytes():
    # Generation-aware VMEM capacity (v5e/v6e: 128 MiB; v7x: 64 MiB per TC).
    try:
        return int(pltpu.get_tpu_info().vmem_capacity_bytes)
    except Exception:
        return 64 << 20  # conservative fallback (v7x per-TC physical VMEM)


def _pos_emb_exact_kernel(pos_ref, freq_ref, out_ref):
    # Used when half = demb//2 is a multiple of 128: the sinusoid argument is
    # computed once, both half-width stores are lane-dense (unmasked vst),
    # and cos is exact (no sin(x + pi/2) rounding drift for large positions).
    # pos_ref: [tile, 1], freq_ref: [1, half], out_ref: [tile, 2*half]
    half = freq_ref.shape[-1]
    x = pos_ref[...] * freq_ref[...]                      # [tile, half]
    out_ref[:, :half] = jnp.sin(x).astype(out_ref.dtype)
    out_ref[:, half:] = jnp.cos(x).astype(out_ref.dtype)


def _pos_emb_fused_kernel(pos_ref, fp_ref, out_ref):
    # Fallback when half is not lane-aligned: one transcendental pass and one
    # full-width store; cos emitted as sin(x + pi/2).
    # pos_ref: [tile, 1]; fp_ref: [2, demb] (row0 = [inv_freq, inv_freq],
    # row1 = [0]*half ++ [pi/2]*half); out_ref: [tile, demb]
    freq = fp_ref[0:1, :]
    phase = fp_ref[1:2, :]
    out_ref[...] = jnp.sin(pos_ref[...] * freq + phase).astype(out_ref.dtype)


@functools.partial(
    jax.jit, static_argnames=("bsz", "tile_seq", "out_dtype", "materialize_bsz"))
def positional_embedding_pallas(pos_seq, inv_freq, bsz=None, *, tile_seq=1024,
                                out_dtype=jnp.float32, materialize_bsz=False):
    """pos_seq: [seq], inv_freq: [demb//2] -> [seq, 1, demb]
    (or [seq, bsz, demb] if bsz is given and materialize_bsz=True)."""
    seq = pos_seq.shape[0]
    half = inv_freq.shape[0]
    demb = 2 * half

    out_itemsize = jnp.dtype(out_dtype).itemsize
    demb_lanes = _round_up(demb, 128)

    # --- Tile selection ------------------------------------------------------
    vmem_cap = _vmem_capacity_bytes()
    # Double-buffered bytes per output row (+ lane-padded [tile, 1] pos row);
    # keep it under ~50% of VMEM so pipelining stays alive on every generation.
    bytes_per_row_db = 2 * (demb_lanes * out_itemsize + 128 * 4)
    max_tile = max(8, ((vmem_cap // 2) // bytes_per_row_db) // 8 * 8)
    tile = min(tile_seq, _round_up(seq, 8), max_tile)
    if seq > 8:
        # Guarantee >= 2 grid steps: writeback of tile i-1 overlaps compute of
        # tile i, and both v7x TensorCores get work under "parallel".
        tile = min(tile, max(8, _round_up((seq + 1) // 2, 8)))
    tile = max(8, (tile // 8) * 8)
    num_tiles = pl.cdiv(seq, tile)   # partial edge block handled by Pallas

    pos2d = pos_seq.astype(jnp.float32).reshape(seq, 1)
    inv_f32 = inv_freq.astype(jnp.float32)

    # --- Compiler params (double-buffered tiles + headroom, clamped) ---------
    tile_bytes = (tile * demb_lanes * out_itemsize     # output tile
                  + tile * 128 * 4                     # [tile, 1] pos tile (lane-padded)
                  + 8 * demb_lanes * 4)                # freq/phase rows (sublane-padded)
    vmem_limit = int(min(vmem_cap, max(16 << 20, 2 * tile_bytes + (4 << 20))))
    compiler_params = pltpu.CompilerParams(
        dimension_semantics=("parallel",),
        vmem_limit_bytes=vmem_limit,
    )

    out_shape = jax.ShapeDtypeStruct((seq, demb), out_dtype)
    pos_spec = pl.BlockSpec((tile, 1), lambda i: (i, 0))
    out_spec = pl.BlockSpec((tile, demb), lambda i: (i, 0))

    if half % 128 == 0:
        # Exact-cos, half-width-argument path (common case: demb >= 256).
        freq_row = inv_f32.reshape(1, half)
        pos_emb = pl.pallas_call(
            _pos_emb_exact_kernel,
            out_shape=out_shape,
            grid=(num_tiles,),
            in_specs=[pos_spec, pl.BlockSpec((1, half), lambda i: (0, 0))],
            out_specs=out_spec,
            compiler_params=compiler_params,
        )(pos2d, freq_row)
    else:
        # TODO(synk): for demb % 128 != 0 (e.g. demb=32) the output stores are
        # masked vst.msk; a wrapper-side repack of several seq rows into one
        # 128-lane group would make them dense, but it only matters for small
        # demb combined with very long seq.
        freq_phase = jnp.stack([
            jnp.concatenate([inv_f32, inv_f32]),
            jnp.concatenate([jnp.zeros((half,), jnp.float32),
                             jnp.full((half,), jnp.pi / 2, dtype=jnp.float32)]),
        ])  # [2, demb]
        pos_emb = pl.pallas_call(
            _pos_emb_fused_kernel,
            out_shape=out_shape,
            grid=(num_tiles,),
            in_specs=[pos_spec, pl.BlockSpec((2, demb), lambda i: (0, 0))],
            out_specs=out_spec,
            compiler_params=compiler_params,
        )(pos2d, freq_phase)

    pos_emb = pos_emb[:, None, :]            # [seq, 1, demb] — free reshape
    if bsz is not None and materialize_bsz:
        # PyTorch's .expand is a zero-copy view; materializing multiplies HBM
        # writes by bsz on an otherwise write-bound op.  Only done on request —
        # prefer consuming the [seq, 1, demb] form downstream.
        pos_emb = jnp.broadcast_to(pos_emb, (seq, bsz, demb))
    return pos_emb


def positional_embedding_ref(pos_seq, inv_freq, bsz=None):
    sinusoid = jnp.outer(pos_seq.astype(jnp.float32), inv_freq.astype(jnp.float32))
    pos_emb = jnp.concatenate([jnp.sin(sinusoid), jnp.cos(sinusoid)], axis=-1)
    pos_emb = pos_emb[:, None, :]
    if bsz is not None:
        pos_emb = jnp.broadcast_to(pos_emb, (pos_emb.shape[0], bsz, pos_emb.shape[-1]))
    return pos_emb


if __name__ == "__main__":
    # --- Small test (module-scale shapes): demb=32, seq=8, bsz=2 -------------
    demb, seq, bsz = 32, 8, 2
    inv_freq = 1.0 / (10000.0 ** (jnp.arange(0.0, demb, 2.0, dtype=jnp.float32) / demb))
    # Transformer-XL uses a descending position sequence.
    pos_seq = jnp.arange(seq - 1, -1, -1, dtype=jnp.float32)

    out = jax.block_until_ready(
        positional_embedding_pallas(pos_seq, inv_freq, bsz=bsz, materialize_bsz=True))
    ref = positional_embedding_ref(pos_seq, inv_freq, bsz=bsz)
    assert out.shape == (seq, bsz, demb), out.shape
    assert jnp.allclose(out, ref, atol=1e-5, rtol=1e-5), "small-case mismatch vs reference"

    # Default: broadcastable [seq, 1, demb] form (analogue of PyTorch's .expand view).
    out_view = jax.block_until_ready(positional_embedding_pallas(pos_seq, inv_freq, bsz=bsz))
    assert out_view.shape == (seq, 1, demb), out_view.shape
    assert jnp.allclose(out_view, ref[:, :1, :], atol=1e-5, rtol=1e-5)

    # --- Lane-aligned demb: exact-cos path, multi-tile, partial edge block ---
    demb2, seq2 = 256, 1000
    inv_freq2 = 1.0 / (10000.0 ** (jnp.arange(0.0, demb2, 2.0, dtype=jnp.float32) / demb2))
    key = jax.random.PRNGKey(0)
    pos_seq2 = jax.random.uniform(key, (seq2,), dtype=jnp.float32, minval=0.0, maxval=50.0)
    out2 = jax.block_until_ready(positional_embedding_pallas(pos_seq2, inv_freq2))
    ref2 = positional_embedding_ref(pos_seq2, inv_freq2)
    assert out2.shape == (seq2, 1, demb2), out2.shape
    assert jnp.allclose(out2, ref2, atol=1e-5, rtol=1e-5), "exact-path mismatch vs reference"

    # --- Non-lane-aligned half: fused path, seq not a multiple of the tile ---
    demb3, seq3 = 128, 100
    inv_freq3 = 1.0 / (10000.0 ** (jnp.arange(0.0, demb3, 2.0, dtype=jnp.float32) / demb3))
    pos_seq3 = jnp.arange(seq3 - 1, -1, -1, dtype=jnp.float32)
    out3 = jax.block_until_ready(positional_embedding_pallas(pos_seq3, inv_freq3))
    ref3 = positional_embedding_ref(pos_seq3, inv_freq3)
    assert out3.shape == (seq3, 1, demb3), out3.shape
    # cos emitted as sin(x + pi/2) on this path -> f32-rounding tolerance.
    assert jnp.allclose(out3, ref3, atol=1e-4, rtol=1e-4), "fused-path mismatch vs reference"

    # --- Optional bf16 output (halves HBM writeback on v5e/v6e) --------------
    out_bf16 = jax.block_until_ready(
        positional_embedding_pallas(pos_seq2, inv_freq2, out_dtype=jnp.bfloat16))
    assert out_bf16.dtype == jnp.bfloat16
    assert jnp.allclose(out_bf16.astype(jnp.float32), ref2, atol=2e-2, rtol=2e-2)

    print("KERNEL_OK")
</pallas_src>

<mosaic_0001>
module attributes {stable_mosaic.version = 11 : i64} {
  func.func @_pos_emb_fused_kernel(%arg0: i32, %arg1: memref<8x1xf32, #tpu.memory_space<vmem>>, %arg2: memref<2x32xf32, #tpu.memory_space<vmem>>, %arg3: memref<8x32xf32, #tpu.memory_space<vmem>>) attributes {dimension_semantics = [#tpu.dimension_semantics<parallel>], iteration_bounds = array<i64: 1>, scalar_prefetch = 0 : i64, scratch_operands = 0 : i64, tpu.core_type = #tpu.core_type<tc>, window_params = [{transform_indices = @transform_0, window_bounds = array<i64: 8, 1>}, {pipeline_mode = #tpu.pipeline_mode<synchronous>, transform_indices = @transform_1, window_bounds = array<i64: 2, 32>}, {transform_indices = @transform_2, window_bounds = array<i64: 8, 32>}]} {
    %c0 = arith.constant 0 : index
    %c0_0 = arith.constant 0 : index
    %0 = vector.load %arg2[%c0, %c0_0] : memref<2x32xf32, #tpu.memory_space<vmem>>, vector<1x32xf32>
    %c1 = arith.constant 1 : index
    %c0_1 = arith.constant 0 : index
    %1 = vector.load %arg2[%c1, %c0_1] : memref<2x32xf32, #tpu.memory_space<vmem>>, vector<1x32xf32>
    %c0_2 = arith.constant 0 : index
    %c0_3 = arith.constant 0 : index
    %2 = vector.load %arg1[%c0_2, %c0_3] : memref<8x1xf32, #tpu.memory_space<vmem>>, vector<8x1xf32>
    %3 = vector.broadcast %2 : vector<8x1xf32> to vector<8x32xf32>
    %4 = vector.broadcast %0 : vector<1x32xf32> to vector<8x32xf32>
    %5 = arith.mulf %3, %4 : vector<8x32xf32>
    %6 = vector.broadcast %1 : vector<1x32xf32> to vector<8x32xf32>
    %7 = arith.addf %5, %6 : vector<8x32xf32>
    %8 = math.sin %7 : vector<8x32xf32>
    %c0_4 = arith.constant 0 : index
    %c0_5 = arith.constant 0 : index
    %9 = vector.load %arg3[%c0_4, %c0_5] : memref<8x32xf32, #tpu.memory_space<vmem>>, vector<8x32xf32>
    tpu.vector_store %arg3[%c0_4, %c0_5], %8 {strides = array<i32>} : memref<8x32xf32, #tpu.memory_space<vmem>>, vector<8x32xf32>,
    return
  }
  func.func @transform_0(%arg0: i32) -> (i32, i32) {
    %c0_i32 = arith.constant 0 : i32
    %c0_i32_0 = arith.constant 0 : i32
    return %arg0, %c0_i32 : i32, i32
  }
  func.func @transform_1(%arg0: i32) -> (i32, i32) {
    %c0_i32 = arith.constant 0 : i32
    %c0_i32_0 = arith.constant 0 : i32
    %c0_i32_1 = arith.constant 0 : i32
    return %c0_i32, %c0_i32_0 : i32, i32
  }
  func.func @transform_2(%arg0: i32) -> (i32, i32) {
    %c0_i32 = arith.constant 0 : i32
    %c0_i32_0 = arith.constant 0 : i32
    return %arg0, %c0_i32 : i32, i32
  }
}

</mosaic_0001>

<bundles_post_ra>
// kernel: positional_embedding_pallas.1
= control target key start
LH: loop header
LB: loop body
LE: loop exit
PB: predicated region body
PF: predicated region fallthrough
CT: control target
= control target key end

     0   :  { %v197_v0 = vmov 0   ;;  %v198_v18 = vmov 683565275   ;;  %v199_v20 = vmov 2475754826   ;;  %s292_s0 = inlined_call_operand.vmem [shape: f32[8,1], index: 0, kind: input, shape index: {}]   ;;  %s293_s1 = inlined_call_operand.vmem [shape: f32[2,32], index: 1, kind: input, shape index: {}]   ;;  %s294_s2 = inlined_call_operand.vmem [shape: f32[8,32], index: 2, kind: output, shape index: {}]  }
   0x1   :  { %194 = vset.pattern.permute.xlu0 %v197_v0  ;;  %v13_v1 = vld [vmem:[%s292_s0] sm:$0xff]  ;;  %v200_v23 = vmov 2131351028   ;;  %v201_v26 = vmov 2102212464  }
   0x2   :  { %16 = vperm.xlu0 %194, %v13_v1   ;;  %v195_v2 = vld [vmem:[%s293_s1] ss:$0 sm:$0xff]  ;;  %v196_v3 = vld [vmem:[%s293_s1 + $0x1] ss:$0 sm:$0xff]  ;;  %v202_v29 = vmov 920167782  }
   0x3   :  { %v203_v32 = vmov 1326507024  }
  0x74   :  { %v17_v4 = vpop.permute.xlu0 %16 }
  0x75   :  { %v20_v5 = vmul.f32 %v195_v2, %v17_v4 }
  0x77   :  { %v229_v6 = vadd.f32 %v196_v3, %v20_v5 }
  0x79   :  { %v26_v7 = vand.u32 2139095040, %v229_v6  ;;  %v23_v10 = vand.u32 2147483647, %v229_v6  ;;  %vm25_vm12 = vcmp.lt.s32.totalorder %v229_v6, 0 }
  0x7b   :  { %v27_v8 = vshrl.u32 %v26_v7, 23  ;;  %v30_v12 = vand.u32 8388607, %v23_v10  ;;  %vm24_vm13 = vcmp.le.f32.partialorder %v23_v10, 0.7853982 }
  0x7d   :  { %v184_v9 = vadd.s32 4294967169, %v27_v8  ;;  %v31_v16 = vor.u32 8388608, %v30_v12 }
  0x7f   :  { %v33_v11 = vadd.s32 1, %v184_v9  ;;  %v246_v39 = vshll.u32 %v31_v16, 8 }
  0x81   :  { %vm34_vm0 = vcmp.gt.s32.totalorder %v33_v11, 0  ;;  %v72_v48 = vand.u32 65535, %v246_v39  ;;  %v73_v49 = vshrl.u32 %v246_v39, 16 }
  0x82   :  { %v35_v13 = vsel %vm34_vm0, %v33_v11, 0  ;;  %vm178_vm0 = vcmask 261120  }
  0x83   :  { %v37_v14 = vand.u32 31, %v35_v13  ;;  %v237_v17 = vshrl.u32 %v35_v13, 5 }
  0x85   :  { %v235_v15 = vsub.s32 32, %v37_v14  ;;  %v40_v19 = vshll.u32 %v198_v18, %v37_v14  ;;  %v43_v21 = vshll.u32 %v199_v20, %v37_v14  ;;  %v46_v25 = vshll.u32 %v200_v23, %v37_v14 }
  0x86   :  { %v49_v28 = vshll.u32 %v201_v26, %v37_v14  ;;  %v52_v31 = vshll.u32 %v202_v29, %v37_v14  ;;  %vm55_vm1 = vcmp.lt.s32.totalorder %v237_v17, 1  ;;  %vm58_vm2 = vcmp.lt.s32.totalorder %v237_v17, 4 }
  0x87   :  { %v41_v22 = vshrl.u32 %v199_v20, %v235_v15  ;;  %v44_v24 = vshrl.u32 %v200_v23, %v235_v15  ;;  %v47_v27 = vshrl.u32 %v201_v26, %v235_v15  ;;  %v50_v30 = vshrl.u32 %v202_v29, %v235_v15 }
  0x88   :  { %v53_v33 = vshrl.u32 %v203_v32, %v235_v15  ;;  %vm57_vm3 = vcmp.lt.s32.totalorder %v237_v17, 3  ;;  %vm56_vm4 = vcmp.lt.s32.totalorder %v237_v17, 2  ;;  %v39_v13 = vshrl.u32 %v198_v18, %v235_v15 }
  0x89   :  { %v42_v34 = vor.u32 %v41_v22, %v40_v19  ;;  %v45_v35 = vor.u32 %v44_v24, %v43_v21  ;;  %v48_v36 = vor.u32 %v47_v27, %v46_v25  ;;  %v51_v37 = vor.u32 %v50_v30, %v49_v28 }
  0x8a   :  { %v54_v38 = vor.u32 %v53_v33, %v52_v31 }
  0x8b   :  { %v63_v40 = vsel %vm55_vm1, %v42_v34, %v45_v35  ;;  %v67_v41 = vsel %vm55_vm1, %v45_v35, %v48_v36  ;;  %v64_v42 = vsel %vm58_vm2, %v51_v37, 920167782  ;;  %v60_v9 = vsel %vm58_vm2, %v48_v36, 2102212464 }
  0x8c   :  { %v68_v43 = vsel %vm58_vm2, %v54_v38, 1326507024  ;;  %v65_v44 = vsel %vm57_vm3, %v48_v36, %v64_v42  ;;  %v59_v22 = vsel %vm55_vm1, %v39_v13, %v42_v34  ;;  %v61_v23 = vsel %vm57_vm3, %v45_v35, %v60_v9 }
  0x8d   :  { %v69_v45 = vsel %vm57_vm3, %v51_v37, %v68_v43  ;;  %v66_v46 = vsel %vm56_vm4, %v63_v40, %v65_v44  ;;  %v62_v15 = vsel %vm56_vm4, %v59_v22, %v61_v23  ;;  %vm166_vm2 = vweird.f32 %v229_v6 }
  0x8e   :  { %v70_v47 = vsel %vm56_vm4, %v67_v41, %v69_v45  ;;  %v96_v52 = vand.u32 65535, %v66_v46  ;;  %v97_v53 = vshrl.u32 %v66_v46, 16  ;;  %v116_v30 = vmul.u32 %v246_v39, %v62_v15 }
  0x8f   :  { %v74_v50 = vand.u32 65535, %v70_v47  ;;  %v75_v51 = vshrl.u32 %v70_v47, 16 }
  0x90   :  { %v99_v56 = vmul.u32 %v97_v53, %v72_v48  ;;  %v100_v57 = vmul.u32 %v96_v52, %v73_v49  ;;  %v98_v61 = vmul.u32 %v96_v52, %v72_v48  ;;  %v101_v2 = vmul.u32 %v97_v53, %v73_v49 }
  0x91   :  { %v77_v54 = vmul.u32 %v75_v51, %v72_v48  ;;  %v78_v55 = vmul.u32 %v74_v50, %v73_v49  ;;  %v76_v58 = vmul.u32 %v74_v50, %v72_v48  ;;  %v79_v60 = vmul.u32 %v75_v51, %v73_v49 }
  0x92   :  { %v102_v62 = vshll.u32 %v99_v56, 16  ;;  %v104_v4 = vshll.u32 %v100_v57, 16  ;;  %v103_v20 = vshrl.u32 %v99_v56, 16  ;;  %v105_v26 = vshrl.u32 %v100_v57, 16 }
  0x93   :  { %v80_v59 = vshll.u32 %v77_v54, 16  ;;  %v82_v63 = vshll.u32 %v78_v55, 16  ;;  %v81_v14 = vshrl.u32 %v77_v54, 16  ;;  %v83_v24 = vshrl.u32 %v78_v55, 16 }
  0x94   :  { %vm106_vm6 = vc.u32 %v98_v61, %v102_v62  ;;  %v108_v5 = vadd.s32 %v102_v62, %v98_v61 }
  0x95   :  { %vm84_vm5 = vc.u32 %v76_v58, %v80_v59  ;;  %v86_v1 = vadd.s32 %v80_v59, %v76_v58  ;;  %v107_v8 = vsel %vm106_vm6, 1, %v197_v0 }
  0x96   :  { %v85_v3 = vsel %vm84_vm5, 1, %v197_v0  ;;  %v109_v12 = vadd.s32 %v107_v8, %v101_v2  ;;  %vm110_vm8 = vc.u32 %v108_v5, %v104_v4  ;;  %v112_v29 = vadd.s32 %v108_v5, %v104_v4 }
  0x97   :  { %v87_v7 = vadd.s32 %v85_v3, %v79_v60  ;;  %vm88_vm7 = vc.u32 %v86_v1, %v82_v63  ;;  %v111_v19 = vsel %vm110_vm8, 1, %v197_v0 }
  0x98   :  { %v89_v11 = vsel %vm88_vm7, 1, %v197_v0  ;;  %v113_v21 = vadd.s32 %v111_v19, %v109_v12 }
  0x99   :  { %v91_v16 = vadd.s32 %v89_v11, %v87_v7 }
  0x9a   :  { %v114_v27 = vadd.s32 %v113_v21, %v103_v20 }
  0x9b   :  { %v92_v25 = vadd.s32 %v91_v16, %v81_v14 }
  0x9c   :  { %v115_v18 = vadd.s32 %v114_v27, %v105_v26 }
  0x9d   :  { %v93_v28 = vadd.s32 %v92_v25, %v83_v24 }
  0x9e   :  { %v119_v0 = vadd.s32 1, %v115_v18 }
  0x9f   :  { %vm118_vm9 = vc.u32 %v93_v28, %v112_v29  ;;  %v117_v17 = vadd.s32 %v112_v29, %v93_v28 }
  0xa0   :  { %v120_v31 = vsel %vm118_vm9, %v119_v0, %v115_v18 }
  0xa1   :  { %v121_v32 = vadd.s32 %v120_v31, %v116_v30 }
  0xa3   :  { %v122_v33 = vadd.s32 536870912, %v121_v32 }
  0xa5   :  { %v123_v34 = vshrl.u32 %v122_v33, 30 }
  0xa7   :  { %v124_v36 = vshll.u32 %v123_v34, 30  ;;  %v147_v55 = vsub.s32 4, %v123_v34 }
  0xa9   :  { %v125_v35 = vsub.s32 %v121_v32, %v124_v36  ;;  %v148_v60 = vsel %vm25_vm12, %v147_v55, %v123_v34 }
  0xaa   :  { %v150_v63 = vsel %vm24_vm13, 0, %v148_v60 }
  0xab   :  { %vm126_vm10 = vcmp.lt.s32.totalorder %v125_v35, 0  ;;  %v127_v37 = vsub.s32 0, %v125_v35  ;;  %v167_v5 = vadd.s32 3, %v150_v63 }
  0xad   :  { %v128_v38 = vsel %vm126_vm10, %v127_v37, %v125_v35  ;;  %v168_v11 = vand.u32 3, %v167_v5 }
  0xae   :  { %v129_v40 = vclz %v128_v38 }
  0xaf   :  { %vm170_vm14 = vcmp.eq.s32.totalorder %v168_v11, 0  ;;  %vm173_vm15 = vcmp.eq.s32.totalorder %v168_v11, 2  ;;  %vm169_vm1 = vcmp.lt.s32.totalorder %v168_v11, 2 }
  0xb0   :  { %v185_v41 = vadd.s32 4294967294, %v129_v40 }
  0xb2   :  { %vm186_vm11 = vcmp.lt.s32.totalorder %v185_v41, 0 }
  0xb3   :  { %v132_v42 = vsel %vm186_vm11, 0, %v185_v41 }
  0xb4   :  { %v133_v43 = vsub.s32 32, %v132_v42  ;;  %v137_v44 = vsub.s32 4294967266, %v132_v42  ;;  %v134_v45 = vshll.u32 %v125_v35, %v132_v42 }
  0xb6   :  { %v135_v46 = vshrl.u32 %v117_v17, %v133_v43  ;;  %v138_v47 = vadd.s32 127, %v137_v44 }
  0xb8   :  { %v136_v39 = vor.u32 %v135_v46, %v134_v45  ;;  %v139_v48 = vshll.u32 %v138_v47, 23 }
  0xba   :  { %v140_v49 = vor.u32 4788187, %v139_v48  ;;  %v143_v51 = vcvt.s32.f32 %v136_v39 }
  0xbc   :  { %v141_v50 = vand.u32 2147483647, %v140_v49 }
  0xbe   :  { %v144_v52 = vmul.f32 %v143_v51, %v141_v50 }
  0xc0   :  { %v145_v53 = vxor.u32 2147483648, %v144_v52 }
  0xc2   :  { %v146_v54 = vsel %vm25_vm12, %v145_v53, %v144_v52 }
  0xc3   :  { %v149_v56 = vsel %vm24_vm13, %v229_v6, %v146_v54 }
  0xc4   :  { %v151_v57 = vmul.f32 %v149_v56, %v149_v56 }
  0xc6   :  { %v152_v58 = vmul.f32 -0.001358992, %v151_v57  ;;  %v159_v59 = vmul.f32 -0.00019511016, %v151_v57 }
  0xc8   :  { %v153_v61 = vadd.f32 0.041655596, %v152_v58  ;;  %v160_v62 = vadd.f32 0.008332121, %v159_v59 }
  0xca   :  { %v154_v1 = vmul.f32 %v153_v61, %v151_v57  ;;  %v161_v2 = vmul.f32 %v160_v62, %v151_v57 }
  0xcc   :  { %v155_v3 = vadd.f32 -0.4999988, %v154_v1  ;;  %v162_v4 = vadd.f32 -0.16666654, %v161_v2 }
  0xce   :  { %v156_v7 = vmul.f32 %v155_v3, %v151_v57  ;;  %v163_v8 = vmul.f32 %v162_v4, %v151_v57 }
  0xd0   :  { %v157_v9 = vadd.f32 1.0, %v156_v7  ;;  %v164_v10 = vadd.f32 1.0, %v163_v8 }
  0xd2   :  { %v165_v12 = vmul.f32 %v164_v10, %v149_v56  ;;  %v174_v13 = vxor.u32 2147483648, %v157_v9 }
  0xd4   :  { %v171_v14 = vxor.u32 2147483648, %v165_v12  ;;  %v175_v19 = vsel %vm173_vm15, %v174_v13, %v165_v12 }
  0xd6   :  { %v172_v16 = vsel %vm170_vm14, %v157_v9, %v171_v14 }
  0xd7   :  { %v176_v20 = vsel %vm169_vm1, %v172_v16, %v175_v19 }
  0xd8   :  { %v177_v21 = vsel %vm166_vm2, nan, %v176_v20 }
  0xd9   :  { %179 = vst.msk [vmem:[%s294_s2] sm:$0xff] %vm178_vm0, %v177_v21 }

</bundles_post_ra>
